<compile_context>
chip_gen: v5e
topology: v5e:2x2
jax: 0.10.0
libtpu: 0.0.40
codegen_flags: <defaults>
</compile_context>

<pallas_src>
import jax
import jax.numpy as jnp
from jax.experimental import pallas as pl
from jax.experimental.pallas import tpu as pltpu


# ----------------------- generation-aware VMEM budget -----------------------

def _vmem_budget():
    try:
        phys = int(pltpu.get_tpu_info().vmem_capacity_bytes)
    except Exception:
        phys = 64 * 1024 * 1024          # v7x-safe fallback
    limit = min(phys // 2, 96 * 1024 * 1024)   # 64 MiB on v5e/v6e, 32 MiB on v7x
    budget = (limit * 3) // 4
    return limit, budget


_VMEM_LIMIT_BYTES, _TILE_BUDGET_BYTES = _vmem_budget()


def _round_up(x, m):
    return ((x + m - 1) // m) * m


def _round_down_tile(t):
    """Round a candidate M tile to 128 alignment (>=128) or 8 alignment."""
    t = int(t)
    if t >= 128:
        return (t // 128) * 128
    return max(8, (t // 8) * 8)


# ----------------------------- Pallas kernels ------------------------------

def _lr_linear_kernel(x_ref, vt_ref, u_ref, b_ref, o_ref):
    # x:(TM,K) f32  vt:(K,R) bf16  u:(R,N) bf16  b:(1,N) f32  o:(TM,N)
    x = x_ref[...].astype(vt_ref.dtype)
    h = jnp.dot(x, vt_ref[...], preferred_element_type=jnp.float32)
    y = jnp.dot(h.astype(u_ref.dtype), u_ref[...],
                preferred_element_type=jnp.float32)
    o_ref[...] = (y + b_ref[...].astype(jnp.float32)).astype(o_ref.dtype)


def _linear_kernel_accout(x_ref, w_ref, b_ref, o_ref):
    # f32 output accumulates directly in the resident output block.
    # grid = (M tiles [parallel], N tiles [parallel], K tiles [arbitrary])
    k = pl.program_id(2)

    @pl.when(k == 0)
    def _():
        o_ref[...] = jnp.broadcast_to(b_ref[...].astype(o_ref.dtype),
                                      o_ref.shape)

    o_ref[...] += jnp.dot(x_ref[...].astype(w_ref.dtype), w_ref[...],
                          preferred_element_type=jnp.float32)


def _linear_kernel_scratch(x_ref, w_ref, b_ref, o_ref, acc_ref):
    # Narrow output dtypes: accumulate in an f32 VMEM scratch.
    k = pl.program_id(2)

    @pl.when(k == 0)
    def _():
        acc_ref[...] = jnp.zeros_like(acc_ref)

    acc_ref[...] += jnp.dot(x_ref[...].astype(w_ref.dtype), w_ref[...],
                            preferred_element_type=jnp.float32)

    @pl.when(k == pl.num_programs(2) - 1)
    def _():
        o_ref[...] = (acc_ref[...]
                      + b_ref[...].astype(jnp.float32)).astype(o_ref.dtype)


# ----------------------------- tile selection -------------------------------

def _pick_tm_lr(K, R, N, x_bytes, w_bytes, out_bytes):
    # Resident weights conservatively counted double-buffered.
    weight_bytes = 2 * ((K * R + R * N) * w_bytes + N * 4)
    per_row = 2 * K * x_bytes + 2 * N * out_bytes
    avail = _TILE_BUDGET_BYTES - weight_bytes
    if avail <= per_row * 8:
        return 0  # signal: fall back to two tiled dense matmuls
    return _round_down_tile(min(512, avail // per_row))


def _pick_k_tile(K):
    # Reduction axis: the tile must divide K exactly (ragged K would pollute
    # the accumulation). Prefer 256-multiples for v6e/v7x's 256x256 MXU.
    for c in (512, 256, 128, 384):
        if K % c == 0:
            return c
    return K  # TODO(synk): mask a ragged K tail for huge awkward K


def _pick_n_tile(N):
    if N <= 512:
        return N            # full dim is always a legal (and resident) block
    return 512              # multiple of 128/256; ragged last N tile is fine


def _pick_tm_dense(tk, tn, x_bytes, w_bytes, out_bytes, use_scratch):
    fixed = 2 * tk * tn * w_bytes + 2 * tn * 4           # weight + bias tiles
    per_row = 2 * tk * x_bytes + 2 * tn * out_bytes
    if use_scratch:
        per_row += tn * 4
    avail = _TILE_BUDGET_BYTES - fixed
    if avail <= per_row * 8:
        return 8
    return _round_down_tile(min(512, avail // per_row))


def _finalize_tm(tm, M):
    """Clamp to M and keep >=2 grid steps for pipeline / megacore occupancy."""
    tm = min(tm, max(8, _round_up(M, 8)))
    if tm >= M and M > 16:
        tm = max(8, _round_down_tile(pl.cdiv(M, 2)))
    return tm


# ------------------------------- wrappers -----------------------------------

@jax.jit
def linear_forward(x, fc_wT, fc_b):
    """Dense path: x @ fc.weight.T + fc.bias with pre-transposed fc_wT: (K, N)."""
    orig_shape = x.shape
    K = orig_shape[-1]
    N = fc_wT.shape[1]
    x2 = x.reshape(-1, K)
    M = x2.shape[0]
    b2 = fc_b.reshape(1, N).astype(jnp.float32)
    out_dtype = x.dtype

    tk = _pick_k_tile(K)
    tn = _pick_n_tile(N)
    use_scratch = (jnp.dtype(out_dtype) != jnp.dtype(jnp.float32))
    tm = _pick_tm_dense(tk, tn, x2.dtype.itemsize, fc_wT.dtype.itemsize,
                        jnp.dtype(out_dtype).itemsize, use_scratch)
    tm = _finalize_tm(tm, M)
    grid = (pl.cdiv(M, tm), pl.cdiv(N, tn), K // tk)

    cost = pl.CostEstimate(
        flops=2 * M * K * N,
        transcendentals=0,
        bytes_accessed=(M * K * x2.dtype.itemsize
                        + K * N * fc_wT.dtype.itemsize
                        + N * 4
                        + M * N * jnp.dtype(out_dtype).itemsize),
    )

    kernel = _linear_kernel_scratch if use_scratch else _linear_kernel_accout
    scratch = [pltpu.VMEM((tm, tn), jnp.float32)] if use_scratch else []

    out = pl.pallas_call(
        kernel,
        out_shape=jax.ShapeDtypeStruct((M, N), out_dtype),
        grid_spec=pltpu.PrefetchScalarGridSpec(
            num_scalar_prefetch=0,
            grid=grid,
            in_specs=[
                pl.BlockSpec((tm, tk), lambda i, j, k: (i, k)),
                pl.BlockSpec((tk, tn), lambda i, j, k: (k, j)),
                pl.BlockSpec((1, tn), lambda i, j, k: (0, j)),
            ],
            out_specs=pl.BlockSpec((tm, tn), lambda i, j, k: (i, j)),
            scratch_shapes=scratch,
        ),
        compiler_params=pltpu.CompilerParams(
            dimension_semantics=("parallel", "parallel", "arbitrary"),
            vmem_limit_bytes=_VMEM_LIMIT_BYTES,
        ),
        cost_estimate=cost,
    )(x2, fc_wT, b2)

    return out.reshape(*orig_shape[:-1], N)


@jax.jit
def lr_linear_forward(x, vt_wT, u_wT, u_b):
    """Low-rank path: (x @ VT.weight.T) @ U.weight.T + U.bias.

    x: (..., K);  vt_wT: (K, R);  u_wT: (R, N);  u_b: (N,) (pre-transposed,
    weights stored in bf16, bias in f32).
    """
    orig_shape = x.shape
    K = orig_shape[-1]
    R = vt_wT.shape[1]
    N = u_wT.shape[1]

    tm = _pick_tm_lr(K, R, N, x.dtype.itemsize, vt_wT.dtype.itemsize,
                     x.dtype.itemsize)
    if tm == 0:
        # Weights too large to keep fully resident: run as two tiled matmuls.
        # (h round-trips HBM here, but both stages stay within the VMEM budget.)
        h = linear_forward(x, vt_wT, jnp.zeros((R,), jnp.float32))
        return linear_forward(h, u_wT, u_b)

    x2 = x.reshape(-1, K)
    M = x2.shape[0]
    b2 = u_b.reshape(1, N).astype(jnp.float32)
    tm = _finalize_tm(tm, M)
    grid_m = pl.cdiv(M, tm)

    cost = pl.CostEstimate(
        flops=2 * M * K * R + 2 * M * R * N,
        transcendentals=0,
        bytes_accessed=(M * K * x2.dtype.itemsize
                        + K * R * vt_wT.dtype.itemsize
                        + R * N * u_wT.dtype.itemsize
                        + N * 4
                        + M * N * x.dtype.itemsize),
    )

    out = pl.pallas_call(
        _lr_linear_kernel,
        out_shape=jax.ShapeDtypeStruct((M, N), x.dtype),
        grid_spec=pltpu.PrefetchScalarGridSpec(
            num_scalar_prefetch=0,
            grid=(grid_m,),
            in_specs=[
                pl.BlockSpec((tm, K), lambda i: (i, 0)),   # streamed activations
                pl.BlockSpec((K, R), lambda i: (0, 0)),    # resident Vt
                pl.BlockSpec((R, N), lambda i: (0, 0)),    # resident U
                pl.BlockSpec((1, N), lambda i: (0, 0)),    # resident bias
            ],
            out_specs=pl.BlockSpec((tm, N), lambda i: (i, 0)),
        ),
        compiler_params=pltpu.CompilerParams(
            dimension_semantics=("parallel",),
            vmem_limit_bytes=_VMEM_LIMIT_BYTES,
        ),
        cost_estimate=cost,
    )(x2, vt_wT, u_wT, b2)

    return out.reshape(*orig_shape[:-1], N)


# -------------------------- parameter construction --------------------------

def init_lr_linear_params(key, ratio, in_channel, out_channel, bias=True):
    """Mirrors LRLinear.__init__ (nn.Linear default uniform init).

    Weights are stored PRE-TRANSPOSED (kernel layout) and in bf16 so the
    forward pass never pays a per-call transpose and feeds the MXU bf16.
    """
    lr = (ratio is not None) and (ratio != 1.0)
    sample_ratio = ratio if lr else 1.0
    num_components = int(round(sample_ratio * min(in_channel, out_channel)))

    params = {"lr": lr, "num_components": num_components}
    if lr:
        k1, k2, k3 = jax.random.split(key, 3)
        bound_vt = 1.0 / jnp.sqrt(in_channel)
        bound_u = 1.0 / jnp.sqrt(num_components)
        vt_w = jax.random.uniform(k1, (num_components, in_channel), jnp.float32,
                                  -bound_vt, bound_vt)
        u_w = jax.random.uniform(k2, (out_channel, num_components), jnp.float32,
                                 -bound_u, bound_u)
        params["vt_wT"] = jnp.asarray(vt_w.T, dtype=jnp.bfloat16)  # (in_ch, rank)
        params["u_wT"] = jnp.asarray(u_w.T, dtype=jnp.bfloat16)    # (rank, out_ch)
        params["u_b"] = (
            jax.random.uniform(k3, (out_channel,), jnp.float32, -bound_u, bound_u)
            if bias else jnp.zeros((out_channel,), jnp.float32))
    else:
        k1, k2 = jax.random.split(key, 2)
        bound = 1.0 / jnp.sqrt(in_channel)
        fc_w = jax.random.uniform(k1, (out_channel, in_channel), jnp.float32,
                                  -bound, bound)
        params["fc_wT"] = jnp.asarray(fc_w.T, dtype=jnp.bfloat16)  # (in_ch, out_ch)
        params["fc_b"] = (
            jax.random.uniform(k2, (out_channel,), jnp.float32, -bound, bound)
            if bias else jnp.zeros((out_channel,), jnp.float32))
    return params


def lr_linear_apply(params, x):
    # scaling_factor arg of the torch forward is unused there; ignored here too.
    if params["lr"]:
        return lr_linear_forward(x, params["vt_wT"], params["u_wT"], params["u_b"])
    return linear_forward(x, params["fc_wT"], params["fc_b"])


# ---------------------------------- main -------------------------------------

if __name__ == "__main__":
    key = jax.random.PRNGKey(0)
    kx, kp1, kp2, kx2, kp3, kx3, kp4 = jax.random.split(key, 7)
    f32 = jnp.float32

    # --- small shapes consistent with the module -----------------------------
    batch, seq, in_channel, out_channel = 2, 8, 32, 32
    ratio = 0.5
    x = jax.random.normal(kx, (batch, seq, in_channel), f32)

    # Low-rank path (ratio=0.5 -> rank=16)
    params_lr = init_lr_linear_params(kp1, ratio, in_channel, out_channel, bias=True)
    y_lr = jax.block_until_ready(lr_linear_apply(params_lr, x))
    ref_lr = ((x @ params_lr["vt_wT"].astype(f32)) @ params_lr["u_wT"].astype(f32)
              + params_lr["u_b"])
    assert y_lr.shape == (batch, seq, out_channel)
    assert jnp.allclose(y_lr, ref_lr, atol=2e-2, rtol=2e-2)

    # Non-low-rank path (ratio=None -> plain linear)
    params_fc = init_lr_linear_params(kp2, None, in_channel, out_channel, bias=True)
    y_fc = jax.block_until_ready(lr_linear_apply(params_fc, x))
    ref_fc = x @ params_fc["fc_wT"].astype(f32) + params_fc["fc_b"]
    assert jnp.allclose(y_fc, ref_fc, atol=2e-2, rtol=2e-2)

    # --- larger LR case exercising M tiling + ragged last tile (no padding) --
    b2_, s2_, in2_, out2_ = 4, 500, 256, 384   # M = 2000 -> tiles of 512, ragged tail
    x_big = jax.random.normal(kx2, (b2_, s2_, in2_), f32)
    params_big = init_lr_linear_params(kp3, 0.25, in2_, out2_, bias=True)
    y_big = jax.block_until_ready(lr_linear_apply(params_big, x_big))
    ref_big = ((x_big @ params_big["vt_wT"].astype(f32))
               @ params_big["u_wT"].astype(f32) + params_big["u_b"])
    assert y_big.shape == (b2_, s2_, out2_)
    assert jnp.allclose(y_big, ref_big, atol=5e-2, rtol=5e-2)

    # --- larger dense case exercising the K-arbitrary accumulation loop ------
    b3_, s3_, in3_, out3_ = 2, 256, 1024, 384  # grid = (>=2, 1, 2)
    x_d = jax.random.normal(kx3, (b3_, s3_, in3_), f32)
    params_d = init_lr_linear_params(kp4, None, in3_, out3_, bias=True)
    y_d = jax.block_until_ready(lr_linear_apply(params_d, x_d))
    ref_d = x_d @ params_d["fc_wT"].astype(f32) + params_d["fc_b"]
    assert y_d.shape == (b3_, s3_, out3_)
    assert jnp.allclose(y_d, ref_d, atol=5e-2, rtol=5e-2)

    print("KERNEL_OK")
</pallas_src>

<mosaic_0001>
module attributes {stable_mosaic.version = 11 : i64} {
  func.func @_lr_linear_kernel(%arg0: i32, %arg1: memref<16x32xf32, #tpu.memory_space<vmem>>, %arg2: memref<32x16xbf16, #tpu.memory_space<vmem>>, %arg3: memref<16x32xbf16, #tpu.memory_space<vmem>>, %arg4: memref<1x32xf32, #tpu.memory_space<vmem>>, %arg5: memref<16x32xf32, #tpu.memory_space<vmem>>) attributes {dimension_semantics = [#tpu.dimension_semantics<parallel>], iteration_bounds = array<i64: 1>, scalar_prefetch = 0 : i64, scratch_operands = 0 : i64, tpu.core_type = #tpu.core_type<tc>, window_params = [{transform_indices = @transform_0, window_bounds = array<i64: 16, 32>}, {pipeline_mode = #tpu.pipeline_mode<synchronous>, transform_indices = @transform_1, window_bounds = array<i64: 32, 16>}, {pipeline_mode = #tpu.pipeline_mode<synchronous>, transform_indices = @transform_2, window_bounds = array<i64: 16, 32>}, {pipeline_mode = #tpu.pipeline_mode<synchronous>, transform_indices = @transform_3, window_bounds = array<i64: 1, 32>}, {transform_indices = @transform_4, window_bounds = array<i64: 16, 32>}]} {
    %c0 = arith.constant 0 : index
    %c0_0 = arith.constant 0 : index
    %0 = vector.load %arg1[%c0, %c0_0] : memref<16x32xf32, #tpu.memory_space<vmem>>, vector<16x32xf32>
    %1 = arith.truncf %0 : vector<16x32xf32> to vector<16x32xbf16>
    %c0_1 = arith.constant 0 : index
    %c0_2 = arith.constant 0 : index
    %2 = vector.load %arg2[%c0_1, %c0_2] : memref<32x16xbf16, #tpu.memory_space<vmem>>, vector<32x16xbf16>
    %cst = arith.constant dense<0.000000e+00> : vector<16x16xf32>
    %3 = tpu.matmul %1, %2, %cst {dimension_numbers = #tpu.dot_dimension_numbers<[1], [0], [0], [1], [0, 0, 1, 1], [], []>} : vector<16x32xbf16>, vector<32x16xbf16>, vector<16x16xf32> -> vector<16x16xf32>
    %4 = arith.truncf %3 : vector<16x16xf32> to vector<16x16xbf16>
    %c0_3 = arith.constant 0 : index
    %c0_4 = arith.constant 0 : index
    %5 = vector.load %arg3[%c0_3, %c0_4] : memref<16x32xbf16, #tpu.memory_space<vmem>>, vector<16x32xbf16>
    %cst_5 = arith.constant dense<0.000000e+00> : vector<16x32xf32>
    %6 = tpu.matmul %4, %5, %cst_5 {dimension_numbers = #tpu.dot_dimension_numbers<[1], [0], [0], [1], [0, 0, 1, 1], [], []>} : vector<16x16xbf16>, vector<16x32xbf16>, vector<16x32xf32> -> vector<16x32xf32>
    %c0_6 = arith.constant 0 : index
    %c0_7 = arith.constant 0 : index
    %7 = vector.load %arg4[%c0_6, %c0_7] : memref<1x32xf32, #tpu.memory_space<vmem>>, vector<1x32xf32>
    %8 = vector.broadcast %7 : vector<1x32xf32> to vector<16x32xf32>
    %9 = arith.addf %6, %8 : vector<16x32xf32>
    %c0_8 = arith.constant 0 : index
    %c0_9 = arith.constant 0 : index
    %10 = vector.load %arg5[%c0_8, %c0_9] : memref<16x32xf32, #tpu.memory_space<vmem>>, vector<16x32xf32>
    tpu.vector_store %arg5[%c0_8, %c0_9], %9 {strides = array<i32>} : memref<16x32xf32, #tpu.memory_space<vmem>>, vector<16x32xf32>,
    return
  }
  func.func @transform_0(%arg0: i32) -> (i32, i32) {
    %c0_i32 = arith.constant 0 : i32
    %c0_i32_0 = arith.constant 0 : i32
    return %arg0, %c0_i32 : i32, i32
  }
  func.func @transform_1(%arg0: i32) -> (i32, i32) {
    %c0_i32 = arith.constant 0 : i32
    %c0_i32_0 = arith.constant 0 : i32
    %c0_i32_1 = arith.constant 0 : i32
    return %c0_i32, %c0_i32_0 : i32, i32
  }
  func.func @transform_2(%arg0: i32) -> (i32, i32) {
    %c0_i32 = arith.constant 0 : i32
    %c0_i32_0 = arith.constant 0 : i32
    %c0_i32_1 = arith.constant 0 : i32
    return %c0_i32, %c0_i32_0 : i32, i32
  }
  func.func @transform_3(%arg0: i32) -> (i32, i32) {
    %c0_i32 = arith.constant 0 : i32
    %c0_i32_0 = arith.constant 0 : i32
    %c0_i32_1 = arith.constant 0 : i32
    return %c0_i32, %c0_i32_0 : i32, i32
  }
  func.func @transform_4(%arg0: i32) -> (i32, i32) {
    %c0_i32 = arith.constant 0 : i32
    %c0_i32_0 = arith.constant 0 : i32
    return %arg0, %c0_i32 : i32, i32
  }
}

</mosaic_0001>

<bundles_post_ra>
// kernel: lr_linear_forward.1
= control target key start
LH: loop header
LB: loop body
LE: loop exit
PB: predicated region body
PF: predicated region fallthrough
CT: control target
= control target key end

     0   :  { %s206_s0 = inlined_call_operand.vmem [shape: f32[16,32], index: 0, kind: input, shape index: {}]   ;;  %s207_s1 = inlined_call_operand.vmem [shape: bf16[32,16], index: 1, kind: input, shape index: {}]   ;;  %s208_s2 = inlined_call_operand.vmem [shape: bf16[16,32], index: 2, kind: input, shape index: {}]   ;;  %s209_s3 = inlined_call_operand.vmem [shape: f32[1,32], index: 3, kind: input, shape index: {}]   ;;  %s210_s4 = inlined_call_operand.hbm [shape: f32[16,32], index: 4, kind: output, shape index: {}]  }
   0x1   :  { %v122_v0 = vld [vmem:[%s207_s1 + $0x8] sm:$0xff] }
   0x2   :  { %9 = vsyncpa [#allocation3], 0  ;;  %48 = vmatpush.bf16.msra.mxu0 %v122_v0  ;;  %v121_v1 = vld [vmem:[%s207_s1] sm:$0xff]  ;;  %v20_v3 = vld [vmem:[%s206_s0 + $0x8] sm:$0xff]  ;;  %vm38_vm0 = vcmask 261120   ;;  %vm69_vm1 = vcmask 130048  }
   0x3   :  { %v19_v2 = vld [vmem:[%s206_s0] sm:$0xff]  ;;  %s154_s0 = smov [#allocation2]   ;;  %s155_s29 = smov 128  }
   0x4   :  { %v21_v4 = vpack.c.bf16 %v20_v3, %v19_v2  ;;  %v123_v5 = vld [vmem:[%s208_s2] sm:$0xff]  ;;  %s93_s26 = sshll.u32 %s154_s0, 4  ;;  %s95_s2 = sshll.u32 %s210_s4, 4  ;;  %s94_s26 = int_to_ptr.vmem [resolvable:$true] %s93_s26  ;;  %s96_s2 = int_to_ptr.hbm [resolvable:$true] %s95_s2 }
   0x5   :  { %80 = vmatpush.bf16.msra.mxu1 %v123_v5  ;;  %v127_v9 = vld [vmem:[%s209_s3] ss:$0 sm:$0xff]  ;;  %s156_s30 = smov 8  }
   0x6   :  { %49 = vmatpush.bf16.msra.mxu0 %v121_v1 }
   0x9   :  { %115 = vmatmul.msk.bf16.vlgmr.msra.gmra.mxu0 %vm38_vm0, %v21_v4 }
  0x86   :  { %v51_v6 = vpop.f32.mrf.mxu0 }
  0x8e   :  { %v53_v7 = vpop.f32.mrf.mxu0 }
  0x8f   :  { %v56_v8 = vpack.c.bf16 %v53_v7, %v51_v6 }
  0x91   :  { %120 = vmatmul.msk.bf16.vlgmr.msra.gmra.mxu1 %vm69_vm1, %v56_v8 }
 0x10e   :  { %v82_v10 = vpop.f32.mrf.mxu1 }
 0x10f   :  { %v83_v11 = vadd.f32 %v127_v9, %v82_v10 }
 0x111   :  { %87 = vst.msk [vmem:[#allocation2] sm:$0xff] %vm38_vm0, %v83_v11 }
 0x116   :  { %v84_v12 = vpop.f32.mrf.mxu1 }
 0x117   :  { %v85_v13 = vadd.f32 %v127_v9, %v84_v12 }
 0x119   :  { %88 = vst.msk [vmem:[#allocation2 + $0x8] sm:$0xff] %vm38_vm0, %v85_v13 }
 0x11a   :  { %101 = dma.vmem_to_hbm [thread:$0]  %s94_s26, 256, %s96_s2, [#allocation3], %s155_s29, %s155_s29, %s156_s30  }
 0x11b   :  { %152 = dma.done.wait [#allocation3], 256  }
 0x11c   :  { %153 = vsyncadd [#allocation3], 4294967040 }
 0x11d   :  { %106 = vsyncpa [#allocation3], 1 }

</bundles_post_ra>
